<compile_context>
chip_gen: v7x
topology: tpu7x:2x2x1
jax: 0.10.0
libtpu: 0.0.40
codegen_flags: <defaults>
</compile_context>

<pallas_src>
import math

import jax
import jax.numpy as jnp
from jax.experimental import pallas as pl
from jax.experimental.pallas import tpu as pltpu


def _round_up(x, m):
    return ((x + m - 1) // m) * m


def mlp_kernel(w1_ref, b1_ref, w2_ref, b2_ref, xT_ref, oT_ref):
    # xT_ref: (2, TILE) VMEM, oT_ref: (4, TILE) VMEM, weights/biases in SMEM.
    x0 = xT_ref[0:1, :]                      # (1, TILE)
    x1 = xT_ref[1:2, :]                      # (1, TILE)

    # Layer 1: a1_j = x0*W1[0,j] + x1*W1[1,j] + b1[j] ; h1 = sigmoid(a1)
    a1_0 = x0 * w1_ref[0, 0] + x1 * w1_ref[1, 0] + b1_ref[0]
    a1_1 = x0 * w1_ref[0, 1] + x1 * w1_ref[1, 1] + b1_ref[1]
    h1_0 = jax.nn.sigmoid(a1_0)
    h1_1 = jax.nn.sigmoid(a1_1)

    # Layer 2 + softmax (matches torch: exp / sum(exp), no max-subtraction).
    e0 = jnp.exp(h1_0 * w2_ref[0, 0] + h1_1 * w2_ref[1, 0] + b2_ref[0])
    e1 = jnp.exp(h1_0 * w2_ref[0, 1] + h1_1 * w2_ref[1, 1] + b2_ref[1])
    e2 = jnp.exp(h1_0 * w2_ref[0, 2] + h1_1 * w2_ref[1, 2] + b2_ref[2])
    e3 = jnp.exp(h1_0 * w2_ref[0, 3] + h1_1 * w2_ref[1, 3] + b2_ref[3])

    denom = (e0 + e1) + (e2 + e3)
    inv = pl.reciprocal(denom, approx=True)       # EUP vrcp (separate VLIW slot)
    inv = inv * (2.0 - denom * inv)               # one Newton step -> ~full f32 precision

    oT_ref[0:1, :] = e0 * inv
    oT_ref[1:2, :] = e1 * inv
    oT_ref[2:3, :] = e2 * inv
    oT_ref[3:4, :] = e3 * inv


def first_network_parameters(x, w1, b1, w2, b2, *, tile_n=2048):
    """Forward pass of FirstNetwork_Parameters via one pipelined Pallas call."""
    n = x.shape[0]
    xT = jnp.asarray(x, jnp.float32).T                        # X.type(torch.float), (2, N)

    tile = min(tile_n, _round_up(max(n, 1), 128))             # lane-aligned batch tile
    n_pad = _round_up(max(n, 1), tile)
    if n_pad != n:
        xT = jnp.pad(xT, ((0, 0), (0, n_pad - n)))            # zero-pad extra columns

    outT = pl.pallas_call(
        mlp_kernel,
        out_shape=jax.ShapeDtypeStruct((4, n_pad), jnp.float32),
        grid=(n_pad // tile,),
        in_specs=[
            pl.BlockSpec(memory_space=pltpu.MemorySpace.SMEM),   # w1 (2,2)
            pl.BlockSpec(memory_space=pltpu.MemorySpace.SMEM),   # b1 (2,)
            pl.BlockSpec(memory_space=pltpu.MemorySpace.SMEM),   # w2 (2,4)
            pl.BlockSpec(memory_space=pltpu.MemorySpace.SMEM),   # b2 (4,)
            pl.BlockSpec((2, tile), lambda i: (0, i)),           # xT, pipelined over batch
        ],
        out_specs=pl.BlockSpec((4, tile), lambda i: (0, i)),
        compiler_params=pltpu.CompilerParams(
            dimension_semantics=("parallel",),                   # split batch across TCs (v7x)
        ),
    )(
        jnp.asarray(w1, jnp.float32),
        jnp.asarray(b1, jnp.float32),
        jnp.asarray(w2, jnp.float32),
        jnp.asarray(b2, jnp.float32),
        xT,
    )
    return outT[:, :n].T                                         # back to (N, 4)


def reference_forward(x, w1, b1, w2, b2):
    a1 = x.astype(jnp.float32) @ w1 + b1
    h1 = jax.nn.sigmoid(a1)
    a2 = h1 @ w2 + b2
    e = jnp.exp(a2)
    return e / jnp.sum(e, axis=-1, keepdims=True)


if __name__ == "__main__":
    key = jax.random.PRNGKey(0)
    kx, kw1, kw2, kx2 = jax.random.split(key, 4)

    # Parameter shapes from the module's __init__ (deterministic synthetic init).
    w1 = jax.random.normal(kw1, (2, 2), dtype=jnp.float32) / math.sqrt(2.0)
    b1 = jnp.zeros((2,), dtype=jnp.float32)
    w2 = jax.random.normal(kw2, (2, 4), dtype=jnp.float32) / math.sqrt(2.0)
    b2 = jnp.zeros((4,), dtype=jnp.float32)

    # Small batch of 2-feature inputs.
    x = jax.random.normal(kx, (8, 2), dtype=jnp.float32)
    out = jax.block_until_ready(first_network_parameters(x, w1, b1, w2, b2))
    ref = reference_forward(x, w1, b1, w2, b2)
    assert out.shape == (8, 4)
    assert jnp.allclose(out, ref, atol=1e-5, rtol=1e-5), "mismatch vs reference (small batch)"

    # Larger batch exercising the pipelined multi-step grid + padding path.
    x2 = jax.random.normal(kx2, (2500, 2), dtype=jnp.float32)
    out2 = jax.block_until_ready(first_network_parameters(x2, w1, b1, w2, b2, tile_n=1024))
    ref2 = reference_forward(x2, w1, b1, w2, b2)
    assert out2.shape == (2500, 4)
    assert jnp.allclose(out2, ref2, atol=1e-5, rtol=1e-5), "mismatch vs reference (grid batch)"

    print("KERNEL_OK")
</pallas_src>

<mosaic_0001>
module attributes {stable_mosaic.version = 11 : i64} {
  func.func @mlp_kernel(%arg0: i32, %arg1: memref<2x2xf32, #tpu.memory_space<smem>>, %arg2: memref<2xf32, #tpu.memory_space<smem>>, %arg3: memref<2x4xf32, #tpu.memory_space<smem>>, %arg4: memref<4xf32, #tpu.memory_space<smem>>, %arg5: memref<2x128xf32, #tpu.memory_space<vmem>>, %arg6: memref<4x128xf32, #tpu.memory_space<vmem>>) attributes {dimension_semantics = [#tpu.dimension_semantics<parallel>], iteration_bounds = array<i64: 1>, scalar_prefetch = 0 : i64, scratch_operands = 0 : i64, tpu.core_type = #tpu.core_type<tc>, window_params = [{transform_indices = @transform_0, window_bounds = array<i64: 2, 2>}, {transform_indices = @transform_1, window_bounds = array<i64: 2>}, {transform_indices = @transform_2, window_bounds = array<i64: 2, 4>}, {transform_indices = @transform_3, window_bounds = array<i64: 4>}, {transform_indices = @transform_4, window_bounds = array<i64: 2, 128>}, {transform_indices = @transform_5, window_bounds = array<i64: 4, 128>}]} {
    %c0 = arith.constant 0 : index
    %c0_0 = arith.constant 0 : index
    %0 = vector.load %arg5[%c0, %c0_0] : memref<2x128xf32, #tpu.memory_space<vmem>>, vector<1x128xf32>
    %c1 = arith.constant 1 : index
    %c0_1 = arith.constant 0 : index
    %1 = vector.load %arg5[%c1, %c0_1] : memref<2x128xf32, #tpu.memory_space<vmem>>, vector<1x128xf32>
    %c0_2 = arith.constant 0 : index
    %c0_3 = arith.constant 0 : index
    %2 = memref.load %arg1[%c0_2, %c0_3] : memref<2x2xf32, #tpu.memory_space<smem>>
    %3 = vector.broadcast %2 : f32 to vector<1x128xf32>
    %4 = arith.mulf %0, %3 : vector<1x128xf32>
    %c1_4 = arith.constant 1 : index
    %c0_5 = arith.constant 0 : index
    %5 = memref.load %arg1[%c1_4, %c0_5] : memref<2x2xf32, #tpu.memory_space<smem>>
    %6 = vector.broadcast %5 : f32 to vector<1x128xf32>
    %7 = arith.mulf %1, %6 : vector<1x128xf32>
    %8 = arith.addf %4, %7 : vector<1x128xf32>
    %c0_6 = arith.constant 0 : index
    %9 = memref.load %arg2[%c0_6] : memref<2xf32, #tpu.memory_space<smem>>
    %10 = vector.broadcast %9 : f32 to vector<1x128xf32>
    %11 = arith.addf %8, %10 : vector<1x128xf32>
    %c0_7 = arith.constant 0 : index
    %c1_8 = arith.constant 1 : index
    %12 = memref.load %arg1[%c0_7, %c1_8] : memref<2x2xf32, #tpu.memory_space<smem>>
    %13 = vector.broadcast %12 : f32 to vector<1x128xf32>
    %14 = arith.mulf %0, %13 : vector<1x128xf32>
    %c1_9 = arith.constant 1 : index
    %c1_10 = arith.constant 1 : index
    %15 = memref.load %arg1[%c1_9, %c1_10] : memref<2x2xf32, #tpu.memory_space<smem>>
    %16 = vector.broadcast %15 : f32 to vector<1x128xf32>
    %17 = arith.mulf %1, %16 : vector<1x128xf32>
    %18 = arith.addf %14, %17 : vector<1x128xf32>
    %c1_11 = arith.constant 1 : index
    %19 = memref.load %arg2[%c1_11] : memref<2xf32, #tpu.memory_space<smem>>
    %20 = vector.broadcast %19 : f32 to vector<1x128xf32>
    %21 = arith.addf %18, %20 : vector<1x128xf32>
    %22 = arith.negf %11 : vector<1x128xf32>
    %23 = math.exp %22 : vector<1x128xf32>
    %cst = arith.constant 1.000000e+00 : f32
    %24 = vector.broadcast %cst : f32 to vector<1x128xf32>
    %25 = arith.addf %24, %23 : vector<1x128xf32>
    %26 = arith.divf %24, %25 : vector<1x128xf32>
    %27 = arith.negf %21 : vector<1x128xf32>
    %28 = math.exp %27 : vector<1x128xf32>
    %cst_12 = arith.constant 1.000000e+00 : f32
    %29 = vector.broadcast %cst_12 : f32 to vector<1x128xf32>
    %30 = arith.addf %29, %28 : vector<1x128xf32>
    %31 = arith.divf %29, %30 : vector<1x128xf32>
    %c0_13 = arith.constant 0 : index
    %c0_14 = arith.constant 0 : index
    %32 = memref.load %arg3[%c0_13, %c0_14] : memref<2x4xf32, #tpu.memory_space<smem>>
    %33 = vector.broadcast %32 : f32 to vector<1x128xf32>
    %34 = arith.mulf %26, %33 : vector<1x128xf32>
    %c1_15 = arith.constant 1 : index
    %c0_16 = arith.constant 0 : index
    %35 = memref.load %arg3[%c1_15, %c0_16] : memref<2x4xf32, #tpu.memory_space<smem>>
    %36 = vector.broadcast %35 : f32 to vector<1x128xf32>
    %37 = arith.mulf %31, %36 : vector<1x128xf32>
    %38 = arith.addf %34, %37 : vector<1x128xf32>
    %c0_17 = arith.constant 0 : index
    %39 = memref.load %arg4[%c0_17] : memref<4xf32, #tpu.memory_space<smem>>
    %40 = vector.broadcast %39 : f32 to vector<1x128xf32>
    %41 = arith.addf %38, %40 : vector<1x128xf32>
    %42 = math.exp %41 : vector<1x128xf32>
    %c0_18 = arith.constant 0 : index
    %c1_19 = arith.constant 1 : index
    %43 = memref.load %arg3[%c0_18, %c1_19] : memref<2x4xf32, #tpu.memory_space<smem>>
    %44 = vector.broadcast %43 : f32 to vector<1x128xf32>
    %45 = arith.mulf %26, %44 : vector<1x128xf32>
    %c1_20 = arith.constant 1 : index
    %c1_21 = arith.constant 1 : index
    %46 = memref.load %arg3[%c1_20, %c1_21] : memref<2x4xf32, #tpu.memory_space<smem>>
    %47 = vector.broadcast %46 : f32 to vector<1x128xf32>
    %48 = arith.mulf %31, %47 : vector<1x128xf32>
    %49 = arith.addf %45, %48 : vector<1x128xf32>
    %c1_22 = arith.constant 1 : index
    %50 = memref.load %arg4[%c1_22] : memref<4xf32, #tpu.memory_space<smem>>
    %51 = vector.broadcast %50 : f32 to vector<1x128xf32>
    %52 = arith.addf %49, %51 : vector<1x128xf32>
    %53 = math.exp %52 : vector<1x128xf32>
    %c0_23 = arith.constant 0 : index
    %c2 = arith.constant 2 : index
    %54 = memref.load %arg3[%c0_23, %c2] : memref<2x4xf32, #tpu.memory_space<smem>>
    %55 = vector.broadcast %54 : f32 to vector<1x128xf32>
    %56 = arith.mulf %26, %55 : vector<1x128xf32>
    %c1_24 = arith.constant 1 : index
    %c2_25 = arith.constant 2 : index
    %57 = memref.load %arg3[%c1_24, %c2_25] : memref<2x4xf32, #tpu.memory_space<smem>>
    %58 = vector.broadcast %57 : f32 to vector<1x128xf32>
    %59 = arith.mulf %31, %58 : vector<1x128xf32>
    %60 = arith.addf %56, %59 : vector<1x128xf32>
    %c2_26 = arith.constant 2 : index
    %61 = memref.load %arg4[%c2_26] : memref<4xf32, #tpu.memory_space<smem>>
    %62 = vector.broadcast %61 : f32 to vector<1x128xf32>
    %63 = arith.addf %60, %62 : vector<1x128xf32>
    %64 = math.exp %63 : vector<1x128xf32>
    %c0_27 = arith.constant 0 : index
    %c3 = arith.constant 3 : index
    %65 = memref.load %arg3[%c0_27, %c3] : memref<2x4xf32, #tpu.memory_space<smem>>
    %66 = vector.broadcast %65 : f32 to vector<1x128xf32>
    %67 = arith.mulf %26, %66 : vector<1x128xf32>
    %c1_28 = arith.constant 1 : index
    %c3_29 = arith.constant 3 : index
    %68 = memref.load %arg3[%c1_28, %c3_29] : memref<2x4xf32, #tpu.memory_space<smem>>
    %69 = vector.broadcast %68 : f32 to vector<1x128xf32>
    %70 = arith.mulf %31, %69 : vector<1x128xf32>
    %71 = arith.addf %67, %70 : vector<1x128xf32>
    %c3_30 = arith.constant 3 : index
    %72 = memref.load %arg4[%c3_30] : memref<4xf32, #tpu.memory_space<smem>>
    %73 = vector.broadcast %72 : f32 to vector<1x128xf32>
    %74 = arith.addf %71, %73 : vector<1x128xf32>
    %75 = math.exp %74 : vector<1x128xf32>
    %76 = arith.addf %42, %53 : vector<1x128xf32>
    %77 = arith.addf %64, %75 : vector<1x128xf32>
    %78 = arith.addf %76, %77 : vector<1x128xf32>
    %79 = tpu.reciprocal %78 {approx = true} : vector<1x128xf32> -> vector<1x128xf32>
    %80 = arith.mulf %78, %79 : vector<1x128xf32>
    %cst_31 = arith.constant 2.000000e+00 : f32
    %81 = vector.broadcast %cst_31 : f32 to vector<1x128xf32>
    %82 = arith.subf %81, %80 : vector<1x128xf32>
    %83 = arith.mulf %79, %82 : vector<1x128xf32>
    %84 = arith.mulf %42, %83 : vector<1x128xf32>
    %c0_32 = arith.constant 0 : index
    %c0_33 = arith.constant 0 : index
    %85 = vector.load %arg6[%c0_32, %c0_33] : memref<4x128xf32, #tpu.memory_space<vmem>>, vector<1x128xf32>
    tpu.vector_store %arg6[%c0_32, %c0_33], %84 {strides = array<i32>} : memref<4x128xf32, #tpu.memory_space<vmem>>, vector<1x128xf32>,
    %86 = arith.mulf %53, %83 : vector<1x128xf32>
    %c1_34 = arith.constant 1 : index
    %c0_35 = arith.constant 0 : index
    %87 = vector.load %arg6[%c1_34, %c0_35] : memref<4x128xf32, #tpu.memory_space<vmem>>, vector<1x128xf32>
    tpu.vector_store %arg6[%c1_34, %c0_35], %86 {strides = array<i32>} : memref<4x128xf32, #tpu.memory_space<vmem>>, vector<1x128xf32>,
    %88 = arith.mulf %64, %83 : vector<1x128xf32>
    %c2_36 = arith.constant 2 : index
    %c0_37 = arith.constant 0 : index
    %89 = vector.load %arg6[%c2_36, %c0_37] : memref<4x128xf32, #tpu.memory_space<vmem>>, vector<1x128xf32>
    tpu.vector_store %arg6[%c2_36, %c0_37], %88 {strides = array<i32>} : memref<4x128xf32, #tpu.memory_space<vmem>>, vector<1x128xf32>,
    %90 = arith.mulf %75, %83 : vector<1x128xf32>
    %c3_38 = arith.constant 3 : index
    %c0_39 = arith.constant 0 : index
    %91 = vector.load %arg6[%c3_38, %c0_39] : memref<4x128xf32, #tpu.memory_space<vmem>>, vector<1x128xf32>
    tpu.vector_store %arg6[%c3_38, %c0_39], %90 {strides = array<i32>} : memref<4x128xf32, #tpu.memory_space<vmem>>, vector<1x128xf32>,
    return
  }
  func.func @transform_0(%arg0: i32) -> (i32, i32) {
    %c0_i32 = arith.constant 0 : i32
    %c0_i32_0 = arith.constant 0 : i32
    %c0_i32_1 = arith.constant 0 : i32
    return %c0_i32, %c0_i32_0 : i32, i32
  }
  func.func @transform_1(%arg0: i32) -> i32 {
    %c0_i32 = arith.constant 0 : i32
    %c0_i32_0 = arith.constant 0 : i32
    return %c0_i32 : i32
  }
  func.func @transform_2(%arg0: i32) -> (i32, i32) {
    %c0_i32 = arith.constant 0 : i32
    %c0_i32_0 = arith.constant 0 : i32
    %c0_i32_1 = arith.constant 0 : i32
    return %c0_i32, %c0_i32_0 : i32, i32
  }
  func.func @transform_3(%arg0: i32) -> i32 {
    %c0_i32 = arith.constant 0 : i32
    %c0_i32_0 = arith.constant 0 : i32
    return %c0_i32 : i32
  }
  func.func @transform_4(%arg0: i32) -> (i32, i32) {
    %c0_i32 = arith.constant 0 : i32
    %c0_i32_0 = arith.constant 0 : i32
    return %c0_i32, %arg0 : i32, i32
  }
  func.func @transform_5(%arg0: i32) -> (i32, i32) {
    %c0_i32 = arith.constant 0 : i32
    %c0_i32_0 = arith.constant 0 : i32
    return %c0_i32, %arg0 : i32, i32
  }
}

</mosaic_0001>

<bundles_post_ra>
// kernel: tpu_custom_call.1
= control target key start
LH: loop header
LB: loop body
LE: loop exit
PB: predicated region body
PF: predicated region fallthrough
CT: control target
= control target key end

     0   :  { %10 = vsyncpa [#allocation4], 0  ;;  %s370_s0 = inlined_call_operand.hbm [shape: f32[2,2], index: 0, kind: input, shape index: {}]   ;;  %s371_s1 = inlined_call_operand.vmem [shape: f32[2], index: 1, kind: input, shape index: {}]   ;;  %s372_s2 = inlined_call_operand.vmem [shape: f32[2,4], index: 2, kind: input, shape index: {}]   ;;  %s373_s3 = inlined_call_operand.vmem [shape: f32[4], index: 3, kind: input, shape index: {}]   ;;  %s374_s4 = inlined_call_operand.vmem [shape: f32[2,128], index: 4, kind: input, shape index: {}]   ;;  %s375_s5 = inlined_call_operand.hbm [shape: f32[4,128], index: 5, kind: output, shape index: {}]  }
   0x1   :  { %11 = vsyncpa [#allocation5], 0 }
   0x2   :  { %12 = vsyncpa [#allocation8], 0  ;;  %s38_s20 = sshll.u32 %s372_s2, 4  ;;  %s39_s20 = int_to_ptr.vmem [resolvable:$true] %s38_s20 }
   0x3   :  { %13 = vsyncpa [#allocation3], 0  ;;  %s220_s21 = scalar_lea.vmem %s39_s20, 32  ;;  %p225_p1 = scmp.lt.s32.totalorder %s39_s20, %s39_s20 }
   0x4   :  { %p221_p0 = scmp.ne.s32.totalorder %s39_s20, %s220_s21  ;;  %p226_p2 = scmp.lt.s32.totalorder %s220_s21, %s220_s21 }
   0x6   :  { %p227_p3 = por %p226_p2, %p225_p1 }
   0x8   :  { %p228_p4 = pnand %p227_p3, %p221_p0 }
   0xa   :  { %231 = shalt.err (!%p228_p4)
}
   0xb   :  { %s296_s22 = smov [#allocation7]   ;;  %s232_s25 = scalar_lea.hbm %s370_s0, 32 }
   0xc   :  { %41 = dma.vmem_to_smem %s39_s20, 32, %s296_s22, [#allocation8]  }
   0xd   :  { %p233_p5 = scmp.ne.s32.totalorder %s370_s0, %s232_s25  ;;  %p236_p6 = scmp.lt.u32.totalorder %s232_s25, %s370_s0 }
   0xf   :  { %p238_p7 = pnand %p236_p6, %p233_p5 }
  0x11   :  { %241 = shalt.err (!%p238_p7)
}
  0x12   :  { %s297_s29 = smov [#allocation2]   ;;  %s28_s9 = sshll.u32 %s371_s1, 4  ;;  %s29_s9 = int_to_ptr.vmem [resolvable:$true] %s28_s9 }
  0x13   :  { %21 = dma.hbm_to_smem %s370_s0, 32, %s297_s29, [#allocation4]  }
  0x14   :  { %s48_s12 = sshll.u32 %s373_s3, 4  ;;  %s242_s13 = scalar_lea.vmem %s29_s9, 16  ;;  %s49_s12 = int_to_ptr.vmem [resolvable:$true] %s48_s12 }
  0x15   :  { %p243_p8 = scmp.ne.s32.totalorder %s29_s9, %s242_s13  ;;  %p247_p9 = scmp.lt.s32.totalorder %s29_s9, %s29_s9 }
  0x16   :  { %p248_p10 = scmp.lt.s32.totalorder %s242_s13, %s242_s13 }
  0x18   :  { %p249_p11 = por %p248_p10, %p247_p9 }
  0x1a   :  { %p250_p12 = pnand %p249_p11, %p243_p8 }
  0x1c   :  { %253 = shalt.err (!%p250_p12)
}
  0x1d   :  { %s298_s14 = smov [#allocation6]   ;;  %s254_s0 = scalar_lea.vmem %s49_s12, 16 }
  0x1e   :  { %31 = dma.vmem_to_smem %s29_s9, 16, %s298_s14, [#allocation5]  }
  0x1f   :  { %p255_p13 = scmp.ne.s32.totalorder %s49_s12, %s254_s0  ;;  %p259_p0 = scmp.lt.s32.totalorder %s49_s12, %s49_s12 }
  0x20   :  { %p260_p1 = scmp.lt.s32.totalorder %s254_s0, %s254_s0 }
  0x22   :  { %p261_p2 = por %p260_p1, %p259_p0 }
  0x24   :  { %p262_p3 = pnand %p261_p2, %p255_p13 }
  0x26   :  { %265 = shalt.err (!%p262_p3)
}
  0x27   :  { %s299_s1 = smov [#allocation9]  }
  0x28   :  { %51 = dma.vmem_to_smem %s49_s12, 16, %s299_s1, [#allocation8]  }
  0x29   :  { %288 = dma.done.wait [#allocation4], 32  }
  0x2a   :  { %289 = vsyncadd [#allocation4], 4294967264 }
  0x2b   :  { %290 = dma.done.wait [#allocation5], 16  }
  0x2c   :  { %291 = vsyncadd [#allocation5], 4294967280 }
  0x2d   :  { %292 = dma.done.wait [#allocation8], 48  }
  0x2e   :  { %293 = vsyncadd [#allocation8], 4294967248 }
  0x2f   :  { %66 = sfence }
  0x30   :  { %s69_s3 = sld [smem:[#allocation2]]  ;;  %s182_s17 = sld [smem:[#allocation2 + $0x1]]  ;;  %v67_v0 = vld [vmem:[%s374_s4] sm:$0x1]  ;;  %v68_v1 = vld [vmem:[%s374_s4 + $0x1] sm:$0x1] }
  0x31   :  { %s181_s15 = sld [smem:[#allocation2 + $0x80]]  ;;  %s183_s18 = sld [smem:[#allocation2 + $0x81]] }
  0x32   :  { %s76_s16 = sld [smem:[#allocation6]]  ;;  %s184_s19 = sld [smem:[#allocation6 + $0x1]] }
  0x33   :  { %s101_s4 = sld [smem:[#allocation7]]  ;;  %s188_s25 = sld [smem:[#allocation7 + $0x1]] }
  0x34   :  { %s187_s24 = sld [smem:[#allocation7 + $0x80]]  ;;  %s189_s26 = sld [smem:[#allocation7 + $0x81]] }
  0x35   :  { %s191_s27 = sld [smem:[#allocation7 + $0x2]]  ;;  %s194_s2 = sld [smem:[#allocation7 + $0x3]] }
  0x36   :  { %v70_v2 = vstv %s69_s3  ;;  %v80_v6 = vstv %s182_s17  ;;  %s192_s28 = sld [smem:[#allocation7 + $0x82]]  ;;  %s195_s29 = sld [smem:[#allocation7 + $0x83]] }
  0x37   :  { %v71_v3 = vmul.f32 %v70_v2, %v67_v0  ;;  %v73_v4 = vstv %s181_s15  ;;  %v83_v7 = vstv %s183_s18  ;;  %v81_v9 = vmul.f32 %v80_v6, %v67_v0  ;;  %s108_s30 = sld [smem:[#allocation9]]  ;;  %s190_s6 = sld [smem:[#allocation9 + $0x1]] }
  0x38   :  { %v74_v5 = vmul.f32 %v73_v4, %v68_v1  ;;  %v77_v8 = vstv %s76_s16  ;;  %v84_v10 = vmul.f32 %v83_v7, %v68_v1  ;;  %v87_v12 = vstv %s184_s19  ;;  %s193_s7 = sld [smem:[#allocation9 + $0x2]]  ;;  %s196_s8 = sld [smem:[#allocation9 + $0x3]] }
  0x39   :  { %v102_v22 = vstv %s101_s4  ;;  %v114_v23 = vstv %s188_s25  ;;  %s300_s9 = smov [#allocation10]  }
  0x3a   :  { %v75_v11 = vadd.f32 %v74_v5, %v71_v3  ;;  %v85_v13 = vadd.f32 %v84_v10, %v81_v9  ;;  %v105_v26 = vstv %s187_s24  ;;  %v117_v27 = vstv %s189_s26  ;;  %s170_s10 = sshll.u32 %s300_s9, 4  ;;  %s171_s10 = int_to_ptr.vmem [resolvable:$true] %s170_s10 }
  0x3b   :  { %v126_v24 = vstv %s191_s27  ;;  %v138_v25 = vstv %s194_s2  ;;  %s266_s11 = scalar_lea.vmem %s171_s10, 64  ;;  %p271_p5 = scmp.lt.s32.totalorder %s171_s10, %s171_s10 }
  0x3c   :  { %v78_v14 = vadd.f32 %v77_v8, %v75_v11  ;;  %v88_v15 = vadd.f32 %v87_v12, %v85_v13  ;;  %v129_v28 = vstv %s192_s28  ;;  %v141_v29 = vstv %s195_s29  ;;  %p267_p4 = scmp.ne.s32.totalorder %s171_s10, %s266_s11  ;;  %p272_p6 = scmp.lt.s32.totalorder %s266_s11, %s266_s11 }
  0x3d   :  { %v109_v40 = vstv %s108_s30  ;;  %v121_v41 = vstv %s190_s6 }
  0x3e   :  { %v185_v16 = vmul.f32 -1.442695, %v78_v14  ;;  %v186_v17 = vmul.f32 -1.442695, %v88_v15  ;;  %v133_v42 = vstv %s193_s7  ;;  %v145_v43 = vstv %s196_s8  ;;  %p273_p7 = por %p272_p6, %p271_p5 }
  0x40   :  { %202 = vpow2.f32 %v185_v16  ;;  %p274_p8 = pnand %p273_p7, %p267_p4 }
  0x41   :  { %204 = vpow2.f32 %v186_v17 }
  0x4a   :  { %v203_v18 = vpop.eup %202 }
  0x4b   :  { %v205_v19 = vpop.eup %204  ;;  %v92_v20 = vadd.f32 1.0, %v203_v18 }
  0x4c   :  { %v98_v21 = vadd.f32 1.0, %v205_v19 }
  0x4d   :  { %206 = vrcp.f32 %v92_v20 }
  0x4e   :  { %208 = vrcp.f32 %v98_v21 }
  0x57   :  { %v207_v30 = vpop.eup %206 }
  0x58   :  { %v209_v31 = vpop.eup %208  ;;  %v103_v32 = vmul.f32 %v207_v30, %v102_v22  ;;  %v115_v33 = vmul.f32 %v207_v30, %v114_v23  ;;  %v127_v34 = vmul.f32 %v207_v30, %v126_v24  ;;  %v139_v35 = vmul.f32 %v207_v30, %v138_v25 }
  0x59   :  { %v106_v36 = vmul.f32 %v209_v31, %v105_v26  ;;  %v118_v37 = vmul.f32 %v209_v31, %v117_v27  ;;  %v130_v38 = vmul.f32 %v209_v31, %v129_v28  ;;  %v142_v39 = vmul.f32 %v209_v31, %v141_v29 }
  0x5b   :  { %v107_v44 = vadd.f32 %v106_v36, %v103_v32  ;;  %v119_v45 = vadd.f32 %v118_v37, %v115_v33  ;;  %v131_v46 = vadd.f32 %v130_v38, %v127_v34  ;;  %v143_v47 = vadd.f32 %v142_v39, %v139_v35 }
  0x5d   :  { %v110_v48 = vadd.f32 %v109_v40, %v107_v44  ;;  %v122_v49 = vadd.f32 %v121_v41, %v119_v45  ;;  %v134_v50 = vadd.f32 %v133_v42, %v131_v46  ;;  %v146_v51 = vadd.f32 %v145_v43, %v143_v47 }
  0x5f   :  { %v111_v52 = vmul.f32 1.442695, %v110_v48  ;;  %v123_v53 = vmul.f32 1.442695, %v122_v49  ;;  %v135_v54 = vmul.f32 1.442695, %v134_v50 }
  0x60   :  { %v147_v55 = vmul.f32 1.442695, %v146_v51 }
  0x61   :  { %210 = vpow2.f32 %v111_v52 }
  0x62   :  { %212 = vpow2.f32 %v123_v53 }
  0x63   :  { %214 = vpow2.f32 %v135_v54 }
  0x64   :  { %216 = vpow2.f32 %v147_v55 }
  0x6b   :  { %v211_v56 = vpop.eup %210 }
  0x6c   :  { %v213_v57 = vpop.eup %212 }
  0x6d   :  { %v215_v58 = vpop.eup %214  ;;  %v149_v59 = vadd.f32 %v213_v57, %v211_v56 }
  0x6e   :  { %v217_v60 = vpop.eup %216 }
  0x6f   :  { %v150_v61 = vadd.f32 %v217_v60, %v215_v58 }
  0x71   :  { %v151_v62 = vadd.f32 %v150_v61, %v149_v59 }
  0x73   :  { %218 = vrcp.f32 %v151_v62 }
  0x7d   :  { %v219_v63 = vpop.eup %218 }
  0x7e   :  { %v153_v0 = vmul.f32 %v219_v63, %v151_v62 }
  0x80   :  { %v154_v1 = vsub.f32 2.0, %v153_v0 }
  0x82   :  { %v155_v2 = vmul.f32 %v219_v63, %v154_v1 }
  0x84   :  { %v156_v3 = vmul.f32 %v211_v56, %v155_v2  ;;  %v158_v4 = vmul.f32 %v213_v57, %v155_v2  ;;  %v160_v5 = vmul.f32 %v215_v58, %v155_v2  ;;  %v162_v6 = vmul.f32 %v217_v60, %v155_v2 }
  0x86   :  { %157 = vst [vmem:[#allocation10] sm:$0x1] %v156_v3  ;;  %159 = vst [vmem:[#allocation10 + $0x1] sm:$0x1] %v158_v4 }
  0x87   :  { %161 = vst [vmem:[#allocation10 + $0x2] sm:$0x1] %v160_v5  ;;  %163 = vst [vmem:[#allocation10 + $0x3] sm:$0x1] %v162_v6 }
  0x88   :  { %277 = shalt.err (!%p274_p8)
}
  0x89   :  { %s278_s14 = scalar_lea.hbm %s375_s5, 64 }
  0x8a   :  { %p279_p9 = scmp.ne.s32.totalorder %s375_s5, %s278_s14  ;;  %p282_p10 = scmp.lt.u32.totalorder %s278_s14, %s375_s5 }
  0x8c   :  { %p284_p11 = pnand %p282_p10, %p279_p9 }
  0x8e   :  { %287 = shalt.err (!%p284_p11)
}
  0x8f   :  { %173 = dma.vmem_to_hbm [thread:$0]  %s171_s10, 64, %s375_s5, [#allocation3]  }
  0x90   :  { %294 = dma.done.wait [#allocation3], 64  }
  0x91   :  { %295 = vsyncadd [#allocation3], 4294967232 }
  0x92   :  { %177 = vsyncpa [#allocation3], 1 }
  0x93   :  { %178 = vsyncpa [#allocation4], 1 }
  0x94   :  { %179 = vsyncpa [#allocation5], 1 }
  0x95   :  { %180 = vsyncpa [#allocation8], 1 }

</bundles_post_ra>
